<compile_context>
chip_gen: v5e
topology: v5e:2x2
jax: 0.10.0
libtpu: 0.0.40
codegen_flags: <defaults>
</compile_context>

<pallas_src>
import functools

import jax
import jax.numpy as jnp
from jax import lax
from jax.experimental import pallas as pl
from jax.experimental.pallas import tpu as pltpu


def _attention_kernel(x_ref, w1_ref, b1_ref, w2_ref, b2_ref, o_ref, h_ref, *, tf):
    # x_ref : (TB, F)  f32   resident across the F-tile axis
    # w1_ref: (H, F)   bf16  resident across the whole grid (lane-dense F)
    # b1_ref: (1, H)   f32
    # w2_ref: (H, TF)  bf16  W2^T tile for this output-F tile (lane-dense F)
    # b2_ref: (1, TF)  f32
    # o_ref : (TB, TF)
    # h_ref : (TB, H)  f32   VMEM scratch, persists across F tiles
    fj = pl.program_id(1)

    @pl.when(fj == 0)
    def _():
        # h = ReLU(x @ W1^T + b1), computed once per batch tile.
        # Contract the last (lane-dense F) dim of both operands on the MXU.
        xb = x_ref[...].astype(jnp.bfloat16)
        h = lax.dot_general(
            xb, w1_ref[...],
            dimension_numbers=(((1,), (1,)), ((), ())),
            preferred_element_type=jnp.float32,
        )
        h_ref[...] = jnp.maximum(h + b1_ref[...], 0.0)
    # TODO(synk): Dropout(p=0.1) after the ReLU is identity in eval mode;
    # train-mode dropout is not implemented.

    # attn tile = Sigmoid(h @ W2^T[:, tile] + b2[tile]); f32 accumulation & math.
    s = jnp.dot(h_ref[...].astype(jnp.bfloat16), w2_ref[...],
                preferred_element_type=jnp.float32) + b2_ref[...]
    attn = jax.nn.sigmoid(s)

    # Gate the already-resident x tile (no extra x HBM traffic).
    start = fj * tf
    if tf % 128 == 0:
        start = pl.multiple_of(start, 128)
    x_tile = x_ref[:, pl.ds(start, tf)]
    o_ref[...] = (x_tile.astype(jnp.float32) * attn).astype(o_ref.dtype)


def fixed_attention_forward(x_flat, w1_bf, b1, w2t_bf, b2, *, tb=None, tf=None):
    """x_flat: (B, F) f32; w1_bf: (H, F) bf16; b1: (H,) f32;
    w2t_bf: (H, F) bf16 (= W2^T); b2: (F,) f32  ->  (B, F)."""
    B, F = x_flat.shape
    Hh = w1_bf.shape[0]
    assert w1_bf.shape == (Hh, F) and w2t_bf.shape == (Hh, F)

    # Batch tile: multiple of 8 (sublane) when possible, else the full batch.
    if tb is None:
        tb = min(B, 128) if B % 8 == 0 else B
    # Output-F tile: lane-dense multiple of 128; fall back to the full F.
    # NOTE: tile sizes must be re-audited against v7x's 64 MiB VMEM for large F.
    if tf is None:
        tf = 512 if (F > 512 and F % 512 == 0) else F

    nb = pl.cdiv(B, tb)
    nf = F // tf

    b1_2d = b1.reshape(1, Hh).astype(jnp.float32)
    b2_2d = b2.reshape(1, F).astype(jnp.float32)

    cost = pl.CostEstimate(
        flops=4 * B * F * Hh,           # two GEMMs
        transcendentals=B * F,          # sigmoid
        bytes_accessed=(2 * x_flat.size * x_flat.dtype.itemsize
                        + w1_bf.size * 2 + w2t_bf.size * 2
                        + b1_2d.size * 4 + b2_2d.size * 4),
    )

    kernel = functools.partial(_attention_kernel, tf=tf)

    return pl.pallas_call(
        kernel,
        out_shape=jax.ShapeDtypeStruct((B, F), x_flat.dtype),
        grid_spec=pltpu.PrefetchScalarGridSpec(
            num_scalar_prefetch=0,
            grid=(nb, nf),
            in_specs=[
                # x: one DMA per batch tile, resident across all F tiles.
                pl.BlockSpec((tb, F), lambda bi, fj: (bi, 0)),
                # W1 / b1: resident for the whole grid.
                pl.BlockSpec((Hh, F), lambda bi, fj: (0, 0)),
                pl.BlockSpec((1, Hh), lambda bi, fj: (0, 0)),
                # W2^T / b2: streamed (double-buffered) per output-F tile.
                pl.BlockSpec((Hh, tf), lambda bi, fj: (0, fj)),
                pl.BlockSpec((1, tf), lambda bi, fj: (0, fj)),
            ],
            out_specs=pl.BlockSpec((tb, tf), lambda bi, fj: (bi, fj)),
            scratch_shapes=[pltpu.VMEM((tb, Hh), jnp.float32)],
        ),
        compiler_params=pltpu.CompilerParams(
            # Batch tiles are independent (v7x megacore can shard them);
            # the F axis reuses the h scratch, so it must stay "arbitrary".
            dimension_semantics=("parallel", "arbitrary"),
        ),
        cost_estimate=cost,
    )(x_flat, w1_bf, b1_2d, w2t_bf, b2_2d)


def spectral_normalize(w):
    """Divide by the top singular value (eval-mode equivalent of
    nn.utils.spectral_norm after power-iteration convergence)."""
    sigma = jnp.linalg.svd(w, compute_uv=False)[0]
    return w / sigma


def prepare_params(w1, b1, w2, b2):
    """One-time parameter prep, OFF the forward hot path:
    spectral norm (full SVD), W2 pre-transpose to (H, F), bf16 weight cast."""
    w1 = spectral_normalize(w1)          # (H, F)   PyTorch layout, lane-dense F
    w2 = spectral_normalize(w2)          # (F, H)
    w1_bf = w1.astype(jnp.bfloat16)      # (H, F)
    w2t_bf = w2.T.astype(jnp.bfloat16)   # (H, F)   lane-dense F
    return w1_bf, b1.astype(jnp.float32), w2t_bf, b2.astype(jnp.float32)


def init_params(key, in_features):
    """nn.Linear-shaped raw params: W1 (F//16, F), b1 (F//16,), W2 (F, F//16), b2 (F,)."""
    hidden = in_features // 16
    k1, k2, k3, k4 = jax.random.split(key, 4)
    bound1 = 1.0 / jnp.sqrt(in_features)
    bound2 = 1.0 / jnp.sqrt(hidden)
    w1 = jax.random.uniform(k1, (hidden, in_features), jnp.float32, -bound1, bound1)
    b1 = jax.random.uniform(k2, (hidden,), jnp.float32, -bound1, bound1)
    w2 = jax.random.uniform(k3, (in_features, hidden), jnp.float32, -bound2, bound2)
    b2 = jax.random.uniform(k4, (in_features,), jnp.float32, -bound2, bound2)
    return w1, b1, w2, b2


def fixed_attention_module(x_nchw, prepared_params):
    """Full module forward: flatten NCHW -> (B, F), run the Pallas kernel."""
    w1_bf, b1, w2t_bf, b2 = prepared_params
    B = x_nchw.shape[0]
    x_flat = x_nchw.reshape(B, -1)       # same as x.view(x.size(0), -1)
    return fixed_attention_forward(x_flat, w1_bf, b1, w2t_bf, b2)


if __name__ == "__main__":
    key = jax.random.PRNGKey(0)
    kx, kp = jax.random.split(key)

    # Small shapes consistent with the module: x (B, C, H, W) = (2, 4, 16, 16)
    # -> F = 1024, hidden = 64; F tiles of 512 -> grid (1, 2).
    B, C, Himg, Wimg = 2, 4, 16, 16
    in_features = C * Himg * Wimg

    x = jax.random.normal(kx, (B, C, Himg, Wimg), jnp.float32)
    w1, b1, w2, b2 = init_params(kp, in_features)

    params = prepare_params(w1, b1, w2, b2)      # SVD + transpose + bf16, once
    out = fixed_attention_module(x, params)
    out = jax.block_until_ready(out)

    # Pure-JAX reference mirroring the kernel's precision (bf16 weights/matmul
    # inputs, f32 accumulation, f32 activations & gating).
    x_flat = x.reshape(B, -1)
    w1_bf, b1f, w2t_bf, b2f = params
    h_ref = lax.dot_general(
        x_flat.astype(jnp.bfloat16), w1_bf,
        dimension_numbers=(((1,), (1,)), ((), ())),
        preferred_element_type=jnp.float32) + b1f
    h_ref = jnp.maximum(h_ref, 0.0)
    s_ref = jnp.dot(h_ref.astype(jnp.bfloat16), w2t_bf,
                    preferred_element_type=jnp.float32) + b2f
    ref = x_flat * jax.nn.sigmoid(s_ref)

    assert out.shape == (B, in_features)
    assert jnp.allclose(out, ref, atol=2e-3, rtol=2e-3), float(jnp.max(jnp.abs(out - ref)))

    print("KERNEL_OK")
</pallas_src>

<mosaic_0001>
module attributes {stable_mosaic.version = 11 : i64} {
  func.func @_attention_kernel(%arg0: i32, %arg1: i32, %arg2: memref<2x1024xf32, #tpu.memory_space<vmem>>, %arg3: memref<64x1024xbf16, #tpu.memory_space<vmem>>, %arg4: memref<1x64xf32, #tpu.memory_space<vmem>>, %arg5: memref<64x512xbf16, #tpu.memory_space<vmem>>, %arg6: memref<1x512xf32, #tpu.memory_space<vmem>>, %arg7: memref<2x512xf32, #tpu.memory_space<vmem>>, %arg8: memref<2x64xf32, #tpu.memory_space<vmem>>) attributes {dimension_semantics = [#tpu.dimension_semantics<parallel>, #tpu.dimension_semantics<arbitrary>], iteration_bounds = array<i64: 1, 2>, scalar_prefetch = 0 : i64, scratch_operands = 1 : i64, tpu.core_type = #tpu.core_type<tc>, window_params = [{transform_indices = @transform_0, window_bounds = array<i64: 2, 1024>}, {pipeline_mode = #tpu.pipeline_mode<synchronous>, transform_indices = @transform_1, window_bounds = array<i64: 64, 1024>}, {pipeline_mode = #tpu.pipeline_mode<synchronous>, transform_indices = @transform_2, window_bounds = array<i64: 1, 64>}, {transform_indices = @transform_3, window_bounds = array<i64: 64, 512>}, {transform_indices = @transform_4, window_bounds = array<i64: 1, 512>}, {transform_indices = @transform_5, window_bounds = array<i64: 2, 512>}]} {
    %c0_i32 = arith.constant 0 : i32
    %0 = arith.cmpi eq, %arg1, %c0_i32 : i32
    %1 = arith.extui %0 : i1 to i32
    %c0_i32_0 = arith.constant 0 : i32
    %2 = arith.cmpi ne, %1, %c0_i32_0 : i32
    scf.if %2 {
      %c0_10 = arith.constant 0 : index
      %c0_11 = arith.constant 0 : index
      %21 = vector.load %arg2[%c0_10, %c0_11] : memref<2x1024xf32, #tpu.memory_space<vmem>>, vector<2x1024xf32>
      %22 = arith.truncf %21 : vector<2x1024xf32> to vector<2x1024xbf16>
      %c0_12 = arith.constant 0 : index
      %c0_13 = arith.constant 0 : index
      %23 = vector.load %arg3[%c0_12, %c0_13] : memref<64x1024xbf16, #tpu.memory_space<vmem>>, vector<64x1024xbf16>
      %cst_14 = arith.constant dense<0.000000e+00> : vector<2x64xf32>
      %24 = tpu.matmul %22, %23, %cst_14 {dimension_numbers = #tpu.dot_dimension_numbers<[1], [1], [0], [0], [0, 0, 1, 0], [], []>} : vector<2x1024xbf16>, vector<64x1024xbf16>, vector<2x64xf32> -> vector<2x64xf32>
      %c0_15 = arith.constant 0 : index
      %c0_16 = arith.constant 0 : index
      %25 = vector.load %arg4[%c0_15, %c0_16] : memref<1x64xf32, #tpu.memory_space<vmem>>, vector<1x64xf32>
      %26 = vector.broadcast %25 : vector<1x64xf32> to vector<2x64xf32>
      %27 = arith.addf %24, %26 : vector<2x64xf32>
      %cst_17 = arith.constant 0.000000e+00 : f32
      %28 = vector.broadcast %cst_17 : f32 to vector<2x64xf32>
      %29 = arith.maximumf %27, %28 : vector<2x64xf32>
      %c0_18 = arith.constant 0 : index
      %c0_19 = arith.constant 0 : index
      %30 = vector.load %arg8[%c0_18, %c0_19] : memref<2x64xf32, #tpu.memory_space<vmem>>, vector<2x64xf32>
      tpu.vector_store %arg8[%c0_18, %c0_19], %29 {strides = array<i32>} : memref<2x64xf32, #tpu.memory_space<vmem>>, vector<2x64xf32>,
    } else {
    }
    %c0 = arith.constant 0 : index
    %c0_1 = arith.constant 0 : index
    %3 = vector.load %arg8[%c0, %c0_1] : memref<2x64xf32, #tpu.memory_space<vmem>>, vector<2x64xf32>
    %4 = arith.truncf %3 : vector<2x64xf32> to vector<2x64xbf16>
    %c0_2 = arith.constant 0 : index
    %c0_3 = arith.constant 0 : index
    %5 = vector.load %arg5[%c0_2, %c0_3] : memref<64x512xbf16, #tpu.memory_space<vmem>>, vector<64x512xbf16>
    %cst = arith.constant dense<0.000000e+00> : vector<2x512xf32>
    %6 = tpu.matmul %4, %5, %cst {dimension_numbers = #tpu.dot_dimension_numbers<[1], [0], [0], [1], [0, 0, 1, 1], [], []>} : vector<2x64xbf16>, vector<64x512xbf16>, vector<2x512xf32> -> vector<2x512xf32>
    %c0_4 = arith.constant 0 : index
    %c0_5 = arith.constant 0 : index
    %7 = vector.load %arg6[%c0_4, %c0_5] : memref<1x512xf32, #tpu.memory_space<vmem>>, vector<1x512xf32>
    %8 = vector.broadcast %7 : vector<1x512xf32> to vector<2x512xf32>
    %9 = arith.addf %6, %8 : vector<2x512xf32>
    %10 = arith.negf %9 : vector<2x512xf32>
    %11 = math.exp %10 : vector<2x512xf32>
    %cst_6 = arith.constant 1.000000e+00 : f32
    %12 = vector.broadcast %cst_6 : f32 to vector<2x512xf32>
    %13 = arith.addf %12, %11 : vector<2x512xf32>
    %14 = arith.divf %12, %13 : vector<2x512xf32>
    %c512_i32 = arith.constant 512 : i32
    %15 = arith.muli %arg1, %c512_i32 : i32
    %16 = tpu.assume_multiple %15, 128 : i32
    %c0_7 = arith.constant 0 : index
    %17 = arith.index_cast %16 : i32 to index
    %18 = vector.load %arg2[%c0_7, %17] : memref<2x1024xf32, #tpu.memory_space<vmem>>, vector<2x512xf32>
    %19 = arith.mulf %18, %14 : vector<2x512xf32>
    %c0_8 = arith.constant 0 : index
    %c0_9 = arith.constant 0 : index
    %20 = vector.load %arg7[%c0_8, %c0_9] : memref<2x512xf32, #tpu.memory_space<vmem>>, vector<2x512xf32>
    tpu.vector_store %arg7[%c0_8, %c0_9], %19 {strides = array<i32>} : memref<2x512xf32, #tpu.memory_space<vmem>>, vector<2x512xf32>,
    return
  }
  func.func @transform_0(%arg0: i32, %arg1: i32) -> (i32, i32) {
    %c0_i32 = arith.constant 0 : i32
    %c0_i32_0 = arith.constant 0 : i32
    return %arg0, %c0_i32 : i32, i32
  }
  func.func @transform_1(%arg0: i32, %arg1: i32) -> (i32, i32) {
    %c0_i32 = arith.constant 0 : i32
    %c0_i32_0 = arith.constant 0 : i32
    %c0_i32_1 = arith.constant 0 : i32
    return %c0_i32, %c0_i32_0 : i32, i32
  }
  func.func @transform_2(%arg0: i32, %arg1: i32) -> (i32, i32) {
    %c0_i32 = arith.constant 0 : i32
    %c0_i32_0 = arith.constant 0 : i32
    %c0_i32_1 = arith.constant 0 : i32
    return %c0_i32, %c0_i32_0 : i32, i32
  }
  func.func @transform_3(%arg0: i32, %arg1: i32) -> (i32, i32) {
    %c0_i32 = arith.constant 0 : i32
    %c0_i32_0 = arith.constant 0 : i32
    return %c0_i32, %arg1 : i32, i32
  }
  func.func @transform_4(%arg0: i32, %arg1: i32) -> (i32, i32) {
    %c0_i32 = arith.constant 0 : i32
    %c0_i32_0 = arith.constant 0 : i32
    return %c0_i32, %arg1 : i32, i32
  }
  func.func @transform_5(%arg0: i32, %arg1: i32) -> (i32, i32) {
    %c0_i32 = arith.constant 0 : i32
    return %arg0, %arg1 : i32, i32
  }
}

</mosaic_0001>

<bundles_post_ra>
// kernel: tpu_custom_call.1
= control target key start
LH: loop header
LB: loop body
LE: loop exit
PB: predicated region body
PF: predicated region fallthrough
CT: control target
= control target key end

     0   :  { %s1964_s0 = inlined_call_operand.hbm [shape: f32[2,1024], index: 0, kind: input, shape index: {}]   ;;  %s1965_s1 = inlined_call_operand.hbm [shape: bf16[64,1024], index: 1, kind: input, shape index: {}]   ;;  %s1966_s2 = inlined_call_operand.vmem [shape: f32[1,64], index: 2, kind: input, shape index: {}]   ;;  %s1967_s3 = inlined_call_operand.hbm [shape: bf16[64,1024], index: 3, kind: input, shape index: {}]   ;;  %s1968_s4 = inlined_call_operand.hbm [shape: f32[1,1024], index: 4, kind: input, shape index: {}]   ;;  %s1969_s5 = inlined_call_operand.hbm [shape: f32[2,1024], index: 5, kind: output, shape index: {}]  }
   0x1   :  { %1976 = sst [smem:[#allocation21_spill]] %s1964_s0 }
   0x2   :  { %1977 = sst [smem:[#allocation22_spill]] %s1965_s1 }
   0x3   :  { %1978 = sst [smem:[#allocation23_spill]] %s1967_s3 }
   0x4   :  { %10 = vsyncpa [#allocation4], 0 }
   0x5   :  { %11 = vsyncpa [#allocation7], 0 }
   0x6   :  { %12 = vsyncpa [#allocation5], 0 }
   0x7   :  { %14 = vsyncpa [#allocation5 + $0x1], 0  ;;  %s1711_s18 = smov 0   ;;  %s1713_s19 = smov 0  }
   0x8   :  { %s1715_s20 = smov 0   ;;  %s1717_s21 = smov 0  }
   0x9   :  { %s1719_s22 = smov 0   ;;  %s1721_s23 = smov 0  }
   0xa LB: > { %1979 = sst [smem:[#allocation15_spill]] %s1653_s18  ;;  %s1742_s24 = sadd.s32 4294967295, %s1673_s23   ;;  %s1673_s23 = sphi %s1721_s23, %s20_s23   ;;  %s1669_s22 = sphi %s1719_s22, %s2008_s22   ;;  %s1665_s21 = sphi %s1717_s21, %s2007_s21   ;;  %s1661_s20 = sphi %s1715_s20, %s2003_s20   ;;  %s1657_s19 = sphi %s1713_s19, %s2006_s19   ;;  %s1653_s18 = sphi %s1711_s18, %s2005_s18  }
   0xb   : > { %1980 = sst [smem:[#allocation16_spill]] %s1661_s20  ;;  %s1080_s25 = sadd.s32 4294967294, %s1673_s23  }
   0xc   : > { %1981 = sst [smem:[#allocation17_spill]] %s1673_s23  ;;  %s29_s26 = sadd.s32 1, %s1669_s22 }
   0xd   : > { %s107_s27 = sadd.s32 1, %s1661_s20  ;;  %p30_p0 = scmp.ge.s32.totalorder %s29_s26, 2 }
   0xe   : > { %p114_p1 = scmp.ne.s32.totalorder %s1661_s20, %s1657_s19  ;;  %p115_p2 = scmp.eq.s32.totalorder %s1673_s23, 0 }
   0xf   : > { %p120_p3 = scmp.ne.s32.totalorder %s1657_s19, %s1653_s18  ;;  %s2010_s26 = smov (%p30_p0, %s29_s26), 0 }
  0x10   : > { %1982 = sst [smem:[#allocation18_spill]] %s2010_s26  ;;  %p1754_p4 = por %p115_p2, %p114_p1 }
  0x11   : > { %p121_p5 = scmp.eq.s32.totalorder %s1742_s24, 0  ;;  %s104_s29 = ssub.s32 %s1669_s22, %s2010_s26 }
  0x12   : > { %p172_p6 = scmp.eq.s32.totalorder %s1742_s24, 1  ;;  %p105_p7 = scmp.eq.s32.totalorder %s104_s29, 0 }
  0x13   : > { %p1764_p8 = por %p121_p5, %p120_p3  ;;  %p178_p10 = scmp.eq.s32.totalorder %s1080_s25, 1 }
  0x14   : > { %p1768_p9 = por %p172_p6, %p114_p1  ;;  %p1081_p12 = scmp.ge.s32.totalorder %s1673_s23, 1 }
  0x15   : > { %s1773_s7 = scalar_select %p105_p7, %s1661_s20, %s107_s27  }
  0x16   : > { %p1775_p11 = por %p178_p10, %p120_p3  ;;  %p185_p13 = scmp.lt.s32.totalorder %s1673_s23, 3 }
  0x17   : > { %1986 = sst [smem:[#allocation19_spill]] %s1773_s7  ;;  %s1675_s13 = smov [#allocation3]  }
  0x18   : > { %s1987_s8 = scalar_select %p1775_p11, 1, 0 }
  0x19   : > { %s1989_s0 = sld [smem:[#allocation21_spill]]  ;;  %p1784_p0 = pnand %p1081_p12, %p185_p13 }
  0x1a   : > { %1988 = sst [smem:[#allocation20_spill]] %s1987_s8  ;;  %s202_s14 = sshll.u32 %s1675_s13, 4  ;;  %s203_s14 = int_to_ptr.vmem [resolvable:$true] %s202_s14 }
  0x1b   : > { %p1084_p1 = scmp.ge.s32.totalorder %s1673_s23, 2  ;;  %p1368_p2 = pneg %p1784_p0 }
  0x1c   : > { %p1388_p3 = scmp.lt.s32.totalorder %s1673_s23, 2  ;;  %s230_s16 = sand.u32 1, %s1673_s23  }
  0x1d   : > { %p1794_p6 = pnand %p1368_p2, %p121_p5  ;;  %s232_s25 = sand.u32 1, %s1661_s20  }
  0x1e   : > { %p1801_p7 = pnand %p1388_p3, %p1754_p4  ;;  %s1085_s27 = sshll.u32 %s232_s25, 7 }
  0x1f   : > { %s200_s11 = sshll.u32 %s1989_s0, 4  ;;  %s1304_s29 = sshll.u32 %s1669_s22, 4  ;;  %s201_s11 = int_to_ptr.hbm [resolvable:$true] %s200_s11 }
  0x20   : > { %1371 = dma.hbm_to_vmem [thread:$0]  (!%p1794_p6), %s201_s11, 256, %s203_s14, [#allocation4]  }
  0x21   : > { %s1993_s3 = sld [smem:[#allocation23_spill]]  ;;  %s234_s0 = scalar_lea.vmem [#allocation8], %s1085_s27 }
  0x22   : > { %s242_s26 = sshll.u32 %s234_s0, 4  ;;  %s1994_s1 = sld [smem:[#allocation22_spill]]  ;;  %s243_s26 = int_to_ptr.vmem [resolvable:$true] %s242_s26 }
  0x23   : > { %s231_s20 = scalar_lea.sflag [#allocation4], %s230_s16  ;;  %s1676_s18 = smov 512  }
  0x24   : > { %s1677_s11 = smov 256   ;;  %s1678_s14 = smov 16  }
  0x25   : > { %s1088_s0 = sshll.u32 %s232_s25, 2  ;;  %s1680_s9 = smov 32  }
  0x26   : > { %s1089_s10 = sshll.u32 %s1669_s22, 2  ;;  %s256_s16 = scalar_lea.vmem [#allocation9], %s1088_s0 }
  0x27   : > { %s239_s13 = scalar_lea.hbm %s1993_s3, %s1304_s29  ;;  %s1679_s29 = smov [#allocation6]  }
  0x28   : > { %s240_s7 = sshll.u32 %s239_s13, 4  ;;  %s211_s8 = sshll.u32 %s1994_s1, 4  ;;  %s241_s7 = int_to_ptr.hbm [resolvable:$true] %s240_s7  ;;  %s212_s8 = int_to_ptr.hbm [resolvable:$true] %s211_s8 }
  0x29   : > { %1378 = dma.hbm_to_vmem [thread:$0]  (!%p1801_p7), %s241_s7, 2048, %s243_s26, %s231_s20, %s1676_s18, %s1677_s11, %s1678_s14  }
  0x2a   : > { %s213_s27 = sshll.u32 %s1679_s29, 4  ;;  %s260_s23 = scalar_lea.hbm %s1968_s4, %s1089_s10  ;;  %s214_s27 = int_to_ptr.vmem [resolvable:$true] %s213_s27 }
  0x2b   : > { %1374 = dma.hbm_to_vmem [thread:$0]  (!%p1794_p6), %s212_s8, 4096, %s214_s27, [#allocation7], %s1676_s18, %s1676_s18, %s1680_s9  }
  0x2c   : > { %s264_s28 = sshll.u32 %s256_s16, 4  ;;  %s262_s1 = sshll.u32 %s260_s23, 4  ;;  %s265_s28 = int_to_ptr.vmem [resolvable:$true] %s264_s28  ;;  %s263_s1 = int_to_ptr.hbm [resolvable:$true] %s262_s1 }
  0x2d   : > { %1381 = dma.hbm_to_vmem [thread:$0]  (!%p1801_p7), %s263_s1, 64, %s265_s28, %s231_s20  }
  0x2e   : > { %273 = sbr.rel (%p1784_p0) target bundleno = 467 (0x1d3), region = 40 }
  0x33   : > { %1636 = dma.done.wait (%p121_p5), [#allocation4], 256  }
  0x34   : > { %1638 = vsyncadd (%p121_p5), [#allocation4], 4294967040 }
  0x35   : > { %1640 = dma.done.wait (%p121_p5), [#allocation7], 4096  }
  0x36   : > { %1642 = vsyncadd (%p121_p5), [#allocation7], 4294963200  ;;  %s285_s3 = sand.u32 1, %s1742_s24   ;;  %s1837_s1 = sand.u32 1, %s1657_s19  }
  0x37   : > { %s1093_s18 = sshll.u32 %s1837_s1, 7  ;;  %s286_s20 = scalar_lea.sflag [#allocation4], %s285_s3 }
  0x38   : > { %s1840_s26 = scalar_lea.vmem [#allocation8], %s1093_s18 }
  0x39   : > { %1644 = dma.done.wait (%p1764_p8), %s286_s20, 2112  }
  0x3a   : > { %1646 = vsyncadd (%p1764_p8), %s286_s20, 4294965184  ;;  %s1094_s7 = sshll.u32 %s1837_s1, 2  ;;  %s1095_s8 = sshll.u32 %s1837_s1, 3 }
  0x3b   : > { %s1848_s12 = scalar_lea.vmem [#allocation9], %s1094_s7  ;;  %s1850_s15 = scalar_lea.vmem [#allocation10], %s1095_s8 }
  0x3c   : > { %p1096_p4 = scmp.ne.s32.totalorder %s1665_s21, 0 }
  0x3e   : > { %339 = sbr.rel (%p1096_p4) target bundleno = 276 (0x114), region = 60 }
  0x43   : > { %v1195_v0 = vld [vmem:[#allocation6 + $0xc0] sm:$0xf]  ;;  %v1329_v2 = vld [vmem:[#allocation6 + $0xc4] sm:$0xf]  ;;  %v1203_v5 = vld [vmem:[#allocation6 + $0xc8] sm:$0xf] }
  0x44   : > { %v1333_v1 = vld [vmem:[#allocation6 + $0xdc] sm:$0xf0]  ;;  %v1197_v4 = vld [vmem:[#allocation6 + $0xe0] sm:$0xf0]  ;;  %v1334_v6 = vld [vmem:[#allocation6 + $0xe4] sm:$0xf0] }
  0x45   : > { %v1196_v3 = vor.u32 %v1333_v1, %v1195_v0  ;;  %v1200_v7 = vor.u32 %v1329_v2, %v1197_v4  ;;  %v1204_v8 = vor.u32 %v1334_v6, %v1203_v5  ;;  %v1330_v9 = vld [vmem:[#allocation6 + $0xcc] sm:$0xf]  ;;  %v1163_v12 = vld [vmem:[#allocation6 + $0x80] sm:$0xf]  ;;  %v1321_v14 = vld [vmem:[#allocation6 + $0x84] sm:$0xf] }
  0x46   : > { %v1205_v10 = vld [vmem:[#allocation6 + $0xe8] sm:$0xf0]  ;;  %v1325_v13 = vld [vmem:[#allocation6 + $0x9c] sm:$0xf0]  ;;  %v1165_v15 = vld [vmem:[#allocation6 + $0xa0] sm:$0xf0] }
  0x47   : > { %571 = vmatpush.bf16.xpose.msra.mxu0 %v1196_v3  ;;  %v1208_v11 = vor.u32 %v1330_v9, %v1205_v10  ;;  %584 = vmatpush.bf16.xpose.msra.mxu1 %v1200_v7  ;;  %v1171_v16 = vld [vmem:[#allocation6 + $0x88] sm:$0xf]  ;;  %v1322_v18 = vld [vmem:[#allocation6 + $0x8c] sm:$0xf]  ;;  %v1164_v20 = vor.u32 %v1325_v13, %v1163_v12  ;;  %v1168_v21 = vor.u32 %v1321_v14, %v1165_v15  ;;  %v1131_v24 = vld [vmem:[#allocation6 + $0x40] sm:$0xf] }
  0x48   : > { %597 = vmatpush.bf16.xpose.msra.mxu2 %v1204_v8  ;;  %v1326_v17 = vld [vmem:[#allocation6 + $0xa4] sm:$0xf0]  ;;  %v1173_v19 = vld [vmem:[#allocation6 + $0xa8] sm:$0xf0]  ;;  %v1317_v25 = vld [vmem:[#allocation6 + $0x5c] sm:$0xf0] }
  0x49   : > { %610 = vmatpush.bf16.xpose.msra.mxu3 %v1208_v11  ;;  %v1172_v22 = vor.u32 %v1326_v17, %v1171_v16  ;;  %v1176_v23 = vor.u32 %v1322_v18, %v1173_v19  ;;  %v1313_v26 = vld [vmem:[#allocation6 + $0x44] sm:$0xf]  ;;  %v1139_v28 = vld [vmem:[#allocation6 + $0x48] sm:$0xf]  ;;  %v340_v30 = vld [vmem:[#allocation3] sm:$0xff]  ;;  %v1132_v33 = vor.u32 %v1317_v25, %v1131_v24  ;;  %vm672_vm0 = vcmask 517120  }
  0x4a   : > { %v1133_v27 = vld [vmem:[#allocation6 + $0x60] sm:$0xf0]  ;;  %v1318_v29 = vld [vmem:[#allocation6 + $0x64] sm:$0xf0]  ;;  %v1314_v31 = vld [vmem:[#allocation6 + $0x4c] sm:$0xf] }
  0x4b   : > { %v1141_v32 = vld [vmem:[#allocation6 + $0x68] sm:$0xf0]  ;;  %344 = vst [vmem:[#allocation1] ss:$4 sm:$0xff] %v340_v30  ;;  %v1136_v34 = vor.u32 %v1313_v26, %v1133_v27  ;;  %v1140_v35 = vor.u32 %v1318_v29, %v1139_v28  ;;  %v1099_v37 = vld [vmem:[#allocation6] sm:$0xf] }
  0x4c   : > { %v1144_v36 = vor.u32 %v1314_v31, %v1141_v32  ;;  %v1309_v38 = vld [vmem:[#allocation6 + $0x1c] sm:$0xf0]  ;;  %v1305_v39 = vld [vmem:[#allocation6 + $0x4] sm:$0xf]  ;;  %v1107_v41 = vld [vmem:[#allocation6 + $0x8] sm:$0xf] }
  0x4d   : > { %v1101_v40 = vld [vmem:[#allocation6 + $0x20] sm:$0xf0]  ;;  %v1310_v42 = vld [vmem:[#allocation6 + $0x24] sm:$0xf0]  ;;  %v1306_v43 = vld [vmem:[#allocation6 + $0xc] sm:$0xf]  ;;  %v1100_v49 = vor.u32 %v1309_v38, %v1099_v37 }
  0x4e   : > { %v1109_v44 = vld [vmem:[#allocation6 + $0x28] sm:$0xf0]  ;;  %v1211_v45 = vld [vmem:[#allocation6 + $0xd0] sm:$0xf]  ;;  %v1331_v47 = vld [vmem:[#allocation6 + $0xd4] sm:$0xf]  ;;  %v1104_v53 = vor.u32 %v1305_v39, %v1101_v40  ;;  %v1108_v54 = vor.u32 %v1310_v42, %v1107_v41 }
  0x4f   : > { %572 = vmatpush.bf16.xpose.msra.mxu0 %v1164_v20  ;;  %585 = vmatpush.bf16.xpose.msra.mxu1 %v1168_v21  ;;  %v1335_v46 = vld [vmem:[#allocation6 + $0xec] sm:$0xf0]  ;;  %v1213_v48 = vld [vmem:[#allocation6 + $0xf0] sm:$0xf0]  ;;  %v1219_v50 = vld [vmem:[#allocation6 + $0xd8] sm:$0xf]  ;;  %v1112_v57 = vor.u32 %v1306_v43, %v1109_v44 }
  0x50   : > { %598 = vmatpush.bf16.xpose.msra.mxu2 %v1172_v22  ;;  %v1336_v51 = vld [vmem:[#allocation6 + $0xf4] sm:$0xf0]  ;;  %v1332_v52 = vld [vmem:[#allocation6 + $0xdc] sm:$0xf]  ;;  %v1212_v58 = vor.u32 %v1335_v46, %v1211_v45  ;;  %v1216_v59 = vor.u32 %v1331_v47, %v1213_v48  ;;  %v1179_v2 = vld [vmem:[#allocation6 + $0x90] sm:$0xf] }
  0x51   : > { %611 = vmatpush.bf16.xpose.msra.mxu3 %v1176_v23  ;;  %v1221_v55 = vld [vmem:[#allocation6 + $0xf8] sm:$0xf0]  ;;  %v1220_v60 = vor.u32 %v1336_v51, %v1219_v50  ;;  %v1327_v3 = vld [vmem:[#allocation6 + $0xac] sm:$0xf0]  ;;  %v1323_v4 = vld [vmem:[#allocation6 + $0x94] sm:$0xf] }
  0x52   : > { %v341_v56 = vld [vmem:[#allocation3 + $0x8] sm:$0xff]  ;;  %v1224_v61 = vor.u32 %v1332_v52, %v1221_v55  ;;  %v347_v62 = vld.sshfl [vmem:[#allocation1] sm:$0xff pattern:$0x73625140]  ;;  %v1181_v7 = vld [vmem:[#allocation6 + $0xb0] sm:$0xf0]  ;;  %v1180_v14 = vor.u32 %v1327_v3, %v1179_v2 }
  0x53   : > { %346 = vst [vmem:[#allocation1 + $0x20] ss:$4 sm:$0xff] %v341_v56  ;;  %v349_v63 = vld.sshfl [vmem:[#allocation1 + $0x10] sm:$0xff pattern:$0x73625140]  ;;  %v363_v5 = vpack.c.bf16 %v347_v62, %v347_v62  ;;  %v1184_v15 = vor.u32 %v1323_v4, %v1181_v7 }
  0x54   : > { %v348_v0 = vld.sshfl [vmem:[#allocation1 + $0x8] sm:$0xff pattern:$0x73625140]  ;;  %v350_v1 = vld.sshfl [vmem:[#allocation1 + $0x18] sm:$0xff pattern:$0x73625140]  ;;  %v365_v6 = vpack.c.bf16 %v349_v63, %v349_v63 }
  0x55   : > { %v1187_v8 = vld [vmem:[#allocation6 + $0x98] sm:$0xf]  ;;  %v364_v10 = vpack.c.bf16 %v348_v0, %v348_v0  ;;  %v366_v11 = vpack.c.bf16 %v350_v1, %v350_v1  ;;  %v1324_v12 = vld [vmem:[#allocation6 + $0x9c] sm:$0xf]  ;;  %v1147_v18 = vld [vmem:[#allocation6 + $0x50] sm:$0xf] }
  0x56   : > { %v1328_v9 = vld [vmem:[#allocation6 + $0xb4] sm:$0xf0]  ;;  %v1189_v13 = vld [vmem:[#allocation6 + $0xb8] sm:$0xf0]  ;;  %v1319_v19 = vld [vmem:[#allocation6 + $0x6c] sm:$0xf0] }
  0x57   : > { %573 = vmatpush.bf16.xpose.msra.mxu0 %v1132_v33  ;;  %586 = vmatpush.bf16.xpose.msra.mxu1 %v1136_v34  ;;  %v1188_v16 = vor.u32 %v1328_v9, %v1187_v8  ;;  %v1192_v17 = vor.u32 %v1324_v12, %v1189_v13  ;;  %v1315_v20 = vld [vmem:[#allocation6 + $0x54] sm:$0xf]  ;;  %v1155_v22 = vld [vmem:[#allocation6 + $0x58] sm:$0xf]  ;;  %v1316_v24 = vld [vmem:[#allocation6 + $0x5c] sm:$0xf]  ;;  %v1148_v26 = vor.u32 %v1319_v19, %v1147_v18 }
  0x58   : > { %599 = vmatpush.bf16.xpose.msra.mxu2 %v1140_v35  ;;  %v1149_v21 = vld [vmem:[#allocation6 + $0x70] sm:$0xf0]  ;;  %v1320_v23 = vld [vmem:[#allocation6 + $0x74] sm:$0xf0]  ;;  %v1157_v25 = vld [vmem:[#allocation6 + $0x78] sm:$0xf0] }
  0x59   : > { %612 = vmatpush.bf16.xpose.msra.mxu3 %v1144_v36  ;;  %v1152_v27 = vor.u32 %v1315_v20, %v1149_v21  ;;  %v1156_v28 = vor.u32 %v1320_v23, %v1155_v22  ;;  %v1160_v29 = vor.u32 %v1316_v24, %v1157_v25  ;;  %v1115_v30 = vld [vmem:[#allocation6 + $0x10] sm:$0xf]  ;;  %v1307_v32 = vld [vmem:[#allocation6 + $0x14] sm:$0xf]  ;;  %v1123_v34 = vld [vmem:[#allocation6 + $0x18] sm:$0xf] }
  0x5a   : > { %v1311_v31 = vld [vmem:[#allocation6 + $0x2c] sm:$0xf0]  ;;  %v1117_v33 = vld [vmem:[#allocation6 + $0x30] sm:$0xf0]  ;;  %v1312_v35 = vld [vmem:[#allocation6 + $0x34] sm:$0xf0] }
  0x5b   : > { %v1308_v36 = vld [vmem:[#allocation6 + $0x1c] sm:$0xf]  ;;  %v1116_v38 = vor.u32 %v1311_v31, %v1115_v30  ;;  %v1120_v39 = vor.u32 %v1307_v32, %v1117_v33  ;;  %v1124_v40 = vor.u32 %v1312_v35, %v1123_v34  ;;  %v351_v42 = vld.sshfl [vmem:[#allocation1 + $0x20] sm:$0xff pattern:$0x73625140] }
  0x5c   : > { %v1125_v37 = vld [vmem:[#allocation6 + $0x38] sm:$0xf0]  ;;  %v352_v43 = vld.sshfl [vmem:[#allocation1 + $0x28] sm:$0xff pattern:$0x73625140]  ;;  %v367_v46 = vpack.c.bf16 %v351_v42, %v351_v42 }
  0x5d   : > { %v1128_v41 = vor.u32 %v1308_v36, %v1125_v37  ;;  %v353_v44 = vld.sshfl [vmem:[#allocation1 + $0x30] sm:$0xff pattern:$0x73625140]  ;;  %v354_v45 = vld.sshfl [vmem:[#allocation1 + $0x38] sm:$0xff pattern:$0x73625140]  ;;  %v368_v47 = vpack.c.bf16 %v352_v43, %v352_v43 }
  0x5e   : > { %v369_v48 = vpack.c.bf16 %v353_v44, %v353_v44  ;;  %v1446_v56 = vld [vmem:[%s1966_s2] ss:$0 sm:$0xff] }
  0x5f   : > { %574 = vmatpush.bf16.xpose.msra.mxu0 %v1100_v49  ;;  %587 = vmatpush.bf16.xpose.msra.mxu1 %v1104_v53  ;;  %v370_v49 = vpack.c.bf16 %v354_v45, %v354_v45 }
  0x60   : > { %600 = vmatpush.bf16.xpose.msra.mxu2 %v1108_v54 }
  0x61   : > { %613 = vmatpush.bf16.xpose.msra.mxu3 %v1112_v57 }
  0x66   : > { %575 = vmatmul.bf16.vlgmr.msra.gmra.mxu0 %v363_v5  ;;  %588 = vmatmul.bf16.vlgmr.msra.gmra.mxu1 %v364_v10 }
  0x67   : > { %623 = vmatpush.bf16.xpose.msrb.mxu0 %v1212_v58  ;;  %636 = vmatpush.bf16.xpose.msrb.mxu1 %v1216_v59 }
  0x68   : > { %649 = vmatpush.bf16.xpose.msrb.mxu2 %v1220_v60  ;;  %614 = vmatmul.bf16.vlgmr.msra.gmra.mxu3 %v366_v11 }
  0x69   : > { %662 = vmatpush.bf16.xpose.msrb.mxu3 %v1224_v61  ;;  %601 = vmatmul.bf16.vlgmr.msra.gmra.mxu2 %v365_v6 }
  0x6f   : > { %624 = vmatpush.bf16.xpose.msrb.mxu0 %v1180_v14  ;;  %637 = vmatpush.bf16.xpose.msrb.mxu1 %v1184_v15 }
  0x70   : > { %650 = vmatpush.bf16.xpose.msrb.mxu2 %v1188_v16 }
  0x71   : > { %663 = vmatpush.bf16.xpose.msrb.mxu3 %v1192_v17 }
  0x77   : > { %625 = vmatpush.bf16.xpose.msrb.mxu0 %v1148_v26  ;;  %638 = vmatpush.bf16.xpose.msrb.mxu1 %v1152_v27 }
  0x78   : > { %651 = vmatpush.bf16.xpose.msrb.mxu2 %v1156_v28 }
  0x79   : > { %664 = vmatpush.bf16.xpose.msrb.mxu3 %v1160_v29 }
  0x7f   : > { %626 = vmatpush.bf16.xpose.msrb.mxu0 %v1116_v38  ;;  %639 = vmatpush.bf16.xpose.msrb.mxu1 %v1120_v39 }
  0x80   : > { %652 = vmatpush.bf16.xpose.msrb.mxu2 %v1124_v40 }
  0x81   : > { %665 = vmatpush.bf16.xpose.msrb.mxu3 %v1128_v41 }
  0x86   : > { %627 = vmatmul.bf16.vlgmr.msrb.gmra.mxu0 %v367_v46  ;;  %640 = vmatmul.bf16.vlgmr.msrb.gmra.mxu1 %v368_v47 }
  0x87   : > { %653 = vmatmul.bf16.vlgmr.msrb.gmra.mxu2 %v369_v48 }
  0x88   : > { %666 = vmatmul.bf16.vlgmr.msrb.gmra.mxu3 %v370_v49 }
  0xe3   : > { %v576_v50 = vpop.f32.mrf.mxu0  ;;  %v589_v51 = vpop.f32.mrf.mxu1 }
  0xe4   : > { %v577_v57 = vadd.f32 %v1446_v56, %v576_v50 }
  0xe6   : > { %v590_v60 = vadd.f32 %v589_v51, %v577_v57 }
  0xeb   : > { %v615_v53 = vpop.f32.mrf.mxu3  ;;  %v578_v54 = vpop.f32.mrf.mxu0 }
  0xec   : > { %v602_v52 = vpop.f32.mrf.mxu2  ;;  %v591_v55 = vpop.f32.mrf.mxu1 }
  0xed   : > { %v603_v61 = vadd.f32 %v602_v52, %v590_v60 }
  0xef   : > { %v616_v62 = vadd.f32 %v615_v53, %v603_v61 }
  0xf3   : > { %v617_v59 = vpop.f32.mrf.mxu3 }
  0xf4   : > { %v604_v58 = vpop.f32.mrf.mxu2 }
 0x103   : > { %v628_v63 = vpop.f32.mrf.mxu0  ;;  %v641_v0 = vpop.f32.mrf.mxu1 }
 0x104   : > { %v629_v1 = vadd.f32 %v628_v63, %v616_v62 }
 0x106   : > { %v642_v2 = vadd.f32 %v641_v0, %v629_v1 }
 0x10a   : > { %v654_v3 = vpop.f32.mrf.mxu2 }
 0x10b   : > { %v655_v4 = vadd.f32 %v654_v3, %v642_v2  ;;  %v667_v5 = vpop.f32.mrf.mxu3  ;;  %v630_v6 = vpop.f32.mrf.mxu0 }
 0x10c   : > { %v643_v7 = vpop.f32.mrf.mxu1 }
 0x10d   : > { %v668_v8 = vadd.f32 %v667_v5, %v655_v4 }
 0x10f   : > { %v671_v9 = vmax.f32 %v668_v8, 0.0 }
 0x111   : > { %673 = vst.msk [vmem:[#allocation2] sm:$0x3] %vm672_vm0, %v671_v9 }
 0x112   : > { %v656_v10 = vpop.f32.mrf.mxu2 }
 0x113   : > { %v669_v11 = vpop.f32.mrf.mxu3 }
 0x114 PF: > { %v1275_v12 = vld [vmem:[%s1840_s26 + $0x60] sm:$0xf]  ;;  %v1351_v13 = vld [vmem:[%s1840_s26 + $0x6c] sm:$0xf0]  ;;  %v1349_v14 = vld [vmem:[%s1840_s26 + $0x64] sm:$0xf] }
 0x115   : > { %v1276_v15 = vor.u32 %v1351_v13, %v1275_v12  ;;  %v1277_v16 = vld [vmem:[%s1840_s26 + $0x70] sm:$0xf0]  ;;  %v1283_v17 = vld [vmem:[%s1840_s26 + $0x68] sm:$0xf]  ;;  %v1352_v18 = vld [vmem:[%s1840_s26 + $0x74] sm:$0xf0] }
 0x116   : > { %v1280_v19 = vor.u32 %v1349_v14, %v1277_v16  ;;  %v1284_v20 = vor.u32 %v1352_v18, %v1283_v17  ;;  %v1350_v21 = vld [vmem:[%s1840_s26 + $0x6c] sm:$0xf]  ;;  %v1285_v22 = vld [vmem:[%s1840_s26 + $0x78] sm:$0xf0]  ;;  %v1259_v23 = vld [vmem:[%s1840_s26 + $0x40] sm:$0xf] }
 0x117   : > { %790 = vmatpush.bf16.msra.mxu0 %v1276_v15  ;;  %v1288_v24 = vor.u32 %v1350_v21, %v1285_v22  ;;  %v1347_v25 = vld [vmem:[%s1840_s26 + $0x4c] sm:$0xf0]  ;;  %v1345_v26 = vld [vmem:[%s1840_s26 + $0x44] sm:$0xf]  ;;  %v1261_v27 = vld [vmem:[%s1840_s26 + $0x50] sm:$0xf0] }
 0x118   : > { %803 = vmatpush.bf16.msra.mxu1 %v1280_v19  ;;  %816 = vmatpush.bf16.msra.mxu2 %v1284_v20  ;;  %v1260_v28 = vor.u32 %v1347_v25, %v1259_v23  ;;  %v1264_v29 = vor.u32 %v1345_v26, %v1261_v27  ;;  %v1267_v30 = vld [vmem:[%s1840_s26 + $0x48] sm:$0xf]  ;;  %v1348_v31 = vld [vmem:[%s1840_s26 + $0x54] sm:$0xf0]  ;;  %v1346_v32 = vld [vmem:[%s1840_s26 + $0x4c] sm:$0xf] }
 0x119   : > { %829 = vmatpush.bf16.msra.mxu3 %v1288_v24  ;;  %v1268_v33 = vor.u32 %v1348_v31, %v1267_v30  ;;  %v1269_v34 = vld [vmem:[%s1840_s26 + $0x58] sm:$0xf0]  ;;  %v1243_v35 = vld [vmem:[%s1840_s26 + $0x20] sm:$0xf]  ;;  %v1343_v36 = vld [vmem:[%s1840_s26 + $0x2c] sm:$0xf0] }
 0x11a   : > { %v1272_v37 = vor.u32 %v1346_v32, %v1269_v34  ;;  %v1341_v38 = vld [vmem:[%s1840_s26 + $0x24] sm:$0xf]  ;;  %v1245_v39 = vld [vmem:[%s1840_s26 + $0x30] sm:$0xf0]  ;;  %v1251_v40 = vld [vmem:[%s1840_s26 + $0x28] sm:$0xf]  ;;  %v1244_v41 = vor.u32 %v1343_v36, %v1243_v35 }
 0x11b   : > { %791 = vmatpush.bf16.msra.mxu0 %v1260_v28  ;;  %v1344_v42 = vld [vmem:[%s1840_s26 + $0x34] sm:$0xf0]  ;;  %v1342_v43 = vld [vmem:[%s1840_s26 + $0x2c] sm:$0xf]  ;;  %v1253_v44 = vld [vmem:[%s1840_s26 + $0x38] sm:$0xf0]  ;;  %v1248_v45 = vor.u32 %v1341_v38, %v1245_v39 }
 0x11c   : > { %804 = vmatpush.bf16.msra.mxu1 %v1264_v29  ;;  %817 = vmatpush.bf16.msra.mxu2 %v1268_v33  ;;  %v1252_v46 = vor.u32 %v1344_v42, %v1251_v40  ;;  %v1227_v47 = vld [vmem:[%s1840_s26] sm:$0xf]  ;;  %v1339_v48 = vld [vmem:[%s1840_s26 + $0xc] sm:$0xf0]  ;;  %v1337_v49 = vld [vmem:[%s1840_s26 + $0x4] sm:$0xf]  ;;  %v1256_v50 = vor.u32 %v1342_v43, %v1253_v44 }
 0x11d   : > { %830 = vmatpush.bf16.msra.mxu3 %v1272_v37  ;;  %v1229_v51 = vld [vmem:[%s1840_s26 + $0x10] sm:$0xf0]  ;;  %v1235_v52 = vld [vmem:[%s1840_s26 + $0x8] sm:$0xf]  ;;  %v1340_v53 = vld [vmem:[%s1840_s26 + $0x14] sm:$0xf0]  ;;  %v1228_v56 = vor.u32 %v1339_v48, %v1227_v47 }
 0x11e   : > { %v1338_v54 = vld [vmem:[%s1840_s26 + $0xc] sm:$0xf]  ;;  %v1237_v55 = vld [vmem:[%s1840_s26 + $0x18] sm:$0xf0]  ;;  %v1232_v58 = vor.u32 %v1337_v49, %v1229_v51  ;;  %v1236_v59 = vor.u32 %v1340_v53, %v1235_v52  ;;  %vm782_vm1 = vcmask 523264   ;;  %s1297_s17 = sshll.u32 %s1665_s21, 9 }
 0x11f   : > { %792 = vmatpush.bf16.msra.mxu0 %v1244_v41  ;;  %v674_v57 = vld [vmem:[#allocation2] sm:$0x3]  ;;  %v1240_v60 = vor.u32 %v1338_v54, %v1237_v55  ;;  %v692_v62 = vld [vmem:[%s1848_s12] sm:$0xf]  ;;  %vm927_vm6 = vcmask 1041408   ;;  %s1906_s25 = sshra.s32 %s1297_s17, 7 }
 0x120   : > { %805 = vmatpush.bf16.msra.mxu1 %v1248_v45  ;;  %818 = vmatpush.bf16.msra.mxu2 %v1252_v46  ;;  %v675_v61 = vpack.c.bf16 %v674_v57, %v674_v57  ;;  %v694_v63 = vperm.slane %v692_v62, 0  ;;  %v695_v0 = vperm.slane %v692_v62, 1  ;;  %v696_v7 = vperm.slane %v692_v62, 2  ;;  %s1298_s11 = sshll.u32 %s1906_s25, 1  ;;  %s1353_s14 = sshll.u32 %s1665_s21, 3 }
 0x121   : > { %831 = vmatpush.bf16.msra.mxu3 %v1256_v50  ;;  %v697_v8 = vperm.slane %v692_v62, 3  ;;  %s950_s27 = scalar_lea.hbm %s1969_s5, %s1353_s14  ;;  %s918_s0 = scalar_lea.vmem [#allocation3], %s1298_s11 }
 0x122   : > { %s952_s9 = sshll.u32 %s1850_s15, 4  ;;  %s954_s10 = sshll.u32 %s950_s27, 4  ;;  %s953_s9 = int_to_ptr.vmem [resolvable:$true] %s952_s9  ;;  %s955_s10 = int_to_ptr.hbm [resolvable:$true] %s954_s10 }
 0x123   : > { %793 = vmatpush.bf16.msra.mxu0 %v1228_v56  ;;  %s937_s13 = scalar_lea.sflag [#allocation5], %s1837_s1  ;;  %s1597_s23 = sshra.s32 %s955_s10, 4  ;;  %s1598_s23 = int_to_ptr.hbm [resolvable:$true] %s1597_s23 }
 0x124   : > { %806 = vmatpush.bf16.msra.mxu1 %v1232_v58  ;;  %819 = vmatpush.bf16.msra.mxu2 %v1236_v59  ;;  %s1599_s16 = scalar_lea.hbm %s1598_s23, 8  ;;  %s1603_s18 = scalar_lea.hbm %s1969_s5, 16 }
 0x125   : > { %832 = vmatpush.bf16.msra.mxu3 %v1240_v60  ;;  %p1600_p5 = scmp.ne.s32.totalorder %s1598_s23, %s1599_s16  ;;  %p1604_p12 = scmp.lt.s32.totalorder %s1598_s23, %s1969_s5 }
 0x126   : > { %1289 = vmatmul.msk.bf16.vlgmr.msra.gmra.mxu0 %vm782_vm1, %v675_v61  ;;  %p1605_p13 = scmp.lt.s32.totalorder %s1603_s18, %s1599_s16 }
 0x127   : > { %1290 = vmatmul.msk.bf16.vlgmr.msra.gmra.mxu1 %vm782_vm1, %v675_v61  ;;  %1291 = vmatmul.msk.bf16.vlgmr.msra.gmra.mxu2 %vm782_vm1, %v675_v61  ;;  %p1601_p8 = pnand %p1600_p5, %p1768_p9 }
 0x128   : > { %1292 = vmatmul.msk.bf16.vlgmr.msra.gmra.mxu3 %vm782_vm1, %v675_v61  ;;  %p1606_p0 = por %p1605_p13, %p1604_p12 }
 0x129   : > { %p1602_p10 = pneg %p1601_p8 }
 0x12b   : > { %p1607_p2 = pnand %p1606_p0, %p1602_p10 }
 0x1a3   : > { %v795_v1 = vpop.f32.mrf.mxu0 }
 0x1a4   : > { %v796_v2 = vadd.f32 %v795_v1, %v694_v63  ;;  %v808_v3 = vpop.f32.mrf.mxu1 }
 0x1a5   : > { %v809_v4 = vadd.f32 %v808_v3, %v695_v0 }
 0x1a6   : > { %v1293_v5 = vmul.f32 -1.442695, %v796_v2 }
 0x1a7   : > { %v1294_v6 = vmul.f32 -1.442695, %v809_v4 }
 0x1a8   : > { %1447 = vpow2.f32 %v1293_v5 }
 0x1a9   : > { %1449 = vpow2.f32 %v1294_v6 }
 0x1aa   : > { %v821_v9 = vpop.f32.mrf.mxu2 }
 0x1ab   : > { %v822_v10 = vadd.f32 %v821_v9, %v696_v7  ;;  %v834_v11 = vpop.f32.mrf.mxu3  ;;  %v797_v12 = vpop.f32.mrf.mxu0 }
 0x1ac   : > { %v835_v13 = vadd.f32 %v834_v11, %v697_v8  ;;  %v810_v14 = vpop.f32.mrf.mxu1  ;;  %v919_v8 = vld [vmem:[%s918_s0] sm:$0xff] }
 0x1ad   : > { %v1295_v15 = vmul.f32 -1.442695, %v822_v10 }
 0x1ae   : > { %v1448_v16 = vpop.eup %1447  ;;  %v1296_v17 = vmul.f32 -1.442695, %v835_v13 }
 0x1af   : > { %v1450_v18 = vpop.eup %1449  ;;  %v1889_v19 = vadd.f32 1.0, %v1448_v16  ;;  %1451 = vpow2.f32 %v1295_v15 }
 0x1b0   : > { %v851_v20 = vadd.f32 1.0, %v1450_v18  ;;  %1453 = vpow2.f32 %v1296_v17 }
 0x1b1   : > { %1455 = vrcp.f32 %v1889_v19  ;;  %vm859_vm4 = vweird.f32 %v1889_v19  ;;  %v865_v55 = vand.u32 2147483648, %v1889_v19  ;;  %v863_v59 = vand.u32 2147483647, %v1889_v19 }
 0x1b2   : > { %1457 = vrcp.f32 %v851_v20  ;;  %v823_v21 = vpop.f32.mrf.mxu2  ;;  %v880_v34 = vand.u32 2147483648, %v851_v20  ;;  %vm874_vm2 = vweird.f32 %v851_v20  ;;  %v878_v41 = vand.u32 2147483647, %v851_v20 }
 0x1b3   : > { %v836_v22 = vpop.f32.mrf.mxu3  ;;  %v866_v3 = vor.u32 1.1754944e-38, %v865_v55 }
 0x1b4   : > { %v881_v42 = vor.u32 1.1754944e-38, %v880_v34  ;;  %vm879_vm9 = vcmp.eq.f32.partialorder %v878_v41, 8.507059e+37 }
 0x1b5   : > { %v1452_v23 = vpop.eup %1451 }
 0x1b6   : > { %v1454_v24 = vpop.eup %1453  ;;  %v852_v25 = vadd.f32 1.0, %v1452_v23 }
 0x1b7   : > { %v1892_v26 = vpop.eup %1455  ;;  %v853_v27 = vadd.f32 1.0, %v1454_v24 }
 0x1b8   : > { %v1458_v28 = vpop.eup %1457  ;;  %v855_v29 = vmul.f32 %v1892_v26, %v1889_v19  ;;  %1459 = vrcp.f32 %v852_v25  ;;  %v895_v44 = vand.u32 2147483648, %v852_v25  ;;  %vm860_vm7 = vweird.f32 %v1892_v26 }
 0x1b9   : > { %v870_v30 = vmul.f32 %v1458_v28, %v851_v20  ;;  %1461 = vrcp.f32 %v853_v27  ;;  %vm875_vm3 = vweird.f32 %v1458_v28  ;;  %v910_v47 = vand.u32 2147483648, %v853_v27  ;;  %vm1911_vm12 = vmor %vm859_vm4, %vm860_vm7 }
 0x1ba   : > { %v856_v32 = vsub.f32 1.0, %v855_v29  ;;  %vm1899_vm5 = vmor %vm874_vm2, %vm875_vm3  ;;  %v893_v50 = vand.u32 2147483647, %v852_v25  ;;  %v908_v51 = vand.u32 2147483647, %v853_v27  ;;  %vm889_vm11 = vweird.f32 %v852_v25 }
 0x1bb   : > { %v871_v31 = vsub.f32 1.0, %v870_v30  ;;  %v896_v58 = vor.u32 1.1754944e-38, %v895_v44  ;;  %vm904_vm13 = vweird.f32 %v853_v27  ;;  %v911_v61 = vor.u32 1.1754944e-38, %v910_v47 }
 0x1bc   : > { %v857_v40 = vmul.f32 %v1892_v26, %v856_v32  ;;  %vm894_vm15 = vcmp.eq.f32.partialorder %v893_v50, 8.507059e+37  ;;  %vm909_vm1 = vcmp.eq.f32.partialorder %v908_v51, 8.507059e+37  ;;  %vm929_vm2 = vcmask 1045508  }
 0x1bd   : > { %v872_v33 = vmul.f32 %v1458_v28, %v871_v31  ;;  %vm864_vm3 = vcmp.eq.f32.partialorder %v863_v59, 8.507059e+37  ;;  %vm931_vm4 = vcmask 1043456  }
 0x1be   : > { %v1460_v35 = vpop.eup %1459  ;;  %v858_v53 = vadd.f32 %v1892_v26, %v857_v40 }
 0x1bf   : > { %v1462_v36 = vpop.eup %1461  ;;  %v885_v37 = vmul.f32 %v1460_v35, %v852_v25  ;;  %v873_v38 = vadd.f32 %v1458_v28, %v872_v33  ;;  %vm890_vm8 = vweird.f32 %v1460_v35 }
 0x1c0   : > { %v900_v39 = vmul.f32 %v1462_v36, %v853_v27  ;;  %vm905_vm10 = vweird.f32 %v1462_v36  ;;  %vm891_vm14 = vmor %vm889_vm11, %vm890_vm8  ;;  %v862_v63 = vsel %vm1911_vm12, %v1892_v26, %v858_v53 }
 0x1c1   : > { %v886_v43 = vsub.f32 1.0, %v885_v37  ;;  %v877_v48 = vsel %vm1899_vm5, %v1458_v28, %v873_v38  ;;  %vm906_vm0 = vmor %vm904_vm13, %vm905_vm10  ;;  %v867_v7 = vsel %vm864_vm3, %v866_v3, %v862_v63 }
 0x1c2   : > { %v901_v46 = vsub.f32 1.0, %v900_v39  ;;  %v882_v56 = vsel %vm879_vm9, %v881_v42, %v877_v48 }
 0x1c3   : > { %v887_v49 = vmul.f32 %v1460_v35, %v886_v43  ;;  %v924_v2 = vrot.slane %v882_v56, 6 }
 0x1c4   : > { %v902_v52 = vmul.f32 %v1462_v36, %v901_v46 }
 0x1c5   : > { %v888_v57 = vadd.f32 %v1460_v35, %v887_v49  ;;  %v928_v9 = vsel %vm927_vm6, %v867_v7, %v924_v2 }
 0x1c6   : > { %v903_v60 = vadd.f32 %v1462_v36, %v902_v52 }
 0x1c7   : > { %v892_v62 = vsel %vm891_vm14, %v1460_v35, %v888_v57 }
 0x1c8   : > { %v897_v0 = vsel %vm894_vm15, %v896_v58, %v892_v62  ;;  %v907_v1 = vsel %vm906_vm0, %v1462_v36, %v903_v60 }
 0x1c9   : > { %v912_v4 = vsel %vm909_vm1, %v911_v61, %v907_v1  ;;  %v925_v5 = vrot.slane %v897_v0, 4 }
 0x1ca   : > { %v926_v6 = vrot.slane %v912_v4, 2 }
 0x1cc   : > { %v930_v10 = vsel %vm929_vm2, %v925_v5, %v926_v6 }
 0x1cd   : > { %v932_v11 = vsel %vm931_vm4, %v928_v9, %v930_v10 }
 0x1ce   : > { %v934_v12 = vmul.f32 %v932_v11, %v919_v8 }
 0x1d0   : > { %935 = vst [vmem:[%s1850_s15] sm:$0xff] %v934_v12 }
 0x1d1   : > { %1610 = shalt.err (!%p1607_p2)
}
 0x1d2   : > { %1366 = dma.vmem_to_hbm [thread:$0]  (%p1768_p9), %s953_s9, 128, %s955_s10, %s937_s13  }
 0x1d3 PF: > { %s1999_s1 = sld [smem:[#allocation15_spill]]  ;;  %p1383_p3 = pnand %p1084_p1, %p1775_p11 }
 0x1d4   : > { %s2001_s8 = sld [smem:[#allocation17_spill]] }
 0x1d5   : > { %p1384_p6 = pneg %p1383_p3 }
 0x1d9   : > { %s966_s12 = sand.u32 1, %s1999_s1  }
 0x1da   : > { %s967_s15 = scalar_lea.sflag [#allocation5], %s966_s12 }
 0x1db   : > { %1648 = dma.done.wait (%p1384_p6), %s967_s15, 128  }
 0x1dc   : > { %1650 = vsyncadd (%p1384_p6), %s967_s15, 4294967168  ;;  %s20_s23 = sadd.s32 1, %s2001_s8   ;;  %s2002_s24 = sld [smem:[#allocation16_spill]] }
 0x1dd   : > { %p17_p7 = scmp.ge.s32.totalorder %s20_s23, 4   ;;  %s2003_s20 = sld [smem:[#allocation19_spill]] }
 0x1de   : > { %s2004_s6 = sld [smem:[#allocation18_spill]]  ;;  %s2005_s18 = smov %s1657_s19 }
 0x1df   : > { %s2007_s21 = smov %s1669_s22 }
 0x1e0   :  { %19 = sbr.rel (!%p17_p7) target bundleno = 10 (0xa), region = 110 }
 0x1e2   : > { %s2006_s19 = smov %s2002_s24 }
 0x1e4   : > { %s2008_s22 = smov %s2004_s6 }
 0x1e5   :  { %973 = vsyncpa [#allocation4], 1 }
 0x1e6   :  { %975 = vsyncpa [#allocation4 + $0x1], 1 }
 0x1e7   :  { %976 = vsyncpa [#allocation7], 1 }
 0x1e8   :  { %977 = vsyncpa [#allocation5], 1 }
 0x1e9   :  { %979 = vsyncpa [#allocation5 + $0x1], 1 }

</bundles_post_ra>
